<compile_context>
chip_gen: v7x
topology: tpu7x:2x2x1
jax: 0.10.0
libtpu: 0.0.40
codegen_flags: <defaults>
</compile_context>

<pallas_src>
import functools

import numpy as np

import jax
import jax.numpy as jnp
from jax.experimental import pallas as pl
from jax.experimental.pallas import tpu as pltpu

EPS = 1e-3                                    # CharbonnierLoss eps
_K1D = (0.05, 0.25, 0.4, 0.25, 0.05)          # separable gaussian; 5x5 = outer(k, k)
_GK = [[a * b for b in _K1D] for a in _K1D]   # used only by the pure-JAX reference

_VMEM_LIMIT_BYTES = 48 << 20   # stays under v7x's 64 MiB physical VMEM
_BLOCK_BUDGET_BYTES = 4 << 20  # raw input bytes per grid step (per array)
_MAX_TB = 8                    # cap on per-step sample batching (unroll length)


# ----------------------- host-side operator precompute ---------------------- #

def _blur_matrix(n):
    """(n x n) matrix of the 5-tap gaussian with replicate padding folded in."""
    a = np.zeros((n, n), np.float64)
    for m, w in enumerate(_K1D):
        for i in range(n):
            a[i, min(max(i + m - 2, 0), n - 1)] += w
    return a


@functools.lru_cache(maxsize=None)
def _laplacian_operators(h, w):
    """Return (Bv, Bhr) with  conv_gauss(4 * parity_mask * conv_gauss(d)) == Bv @ d @ Bhr."""
    av = _blur_matrix(h)                       # vertical (row) blur, H x H
    ah = _blur_matrix(w)                       # horizontal (col) blur, W x W
    dr = np.diag((np.arange(h) % 2 == 0).astype(np.float64))
    dc = np.diag((np.arange(w) % 2 == 0).astype(np.float64))
    bv = (2.0 * av @ dr @ av).astype(np.float32)          # left operator  (H, H)
    bhr = (2.0 * ah.T @ dc @ ah.T).astype(np.float32)     # right operator (W, W)
    return bv, bhr


def _pick_tb(n, plane_bytes):
    """Largest divisor of n that keeps a block under budget (and <= _MAX_TB)."""
    cap = int(max(1, min(n, _MAX_TB, _BLOCK_BUDGET_BYTES // max(plane_bytes, 1))))
    for t in range(cap, 0, -1):
        if n % t == 0:
            return t
    return 1


# ------------------------------ Pallas kernel ------------------------------- #

def _fused_kernel(x_ref, y_ref, bv_ref, bhr_ref, l1_ref, edge_ref, *, eps, tb):
    """One grid step = `tb` samples of one channel of the NCHW inputs.

    Always:        plain Charbonnier partial sum over the block (L1 term).
    If channel>=1: edge Charbonnier partial sum, using laplacian linearity
                   (laplacian(x)-laplacian(y) == laplacian(x-y)) and the
                   precomputed MXU operators:  lap = d - Bv @ (d @ Bhr).
    """
    c = pl.program_id(1)

    x = x_ref[...].astype(jnp.float32)         # (tb, 1, H, W)
    y = y_ref[...].astype(jnp.float32)
    d = x - y

    # plain L1 Charbonnier partial (every channel) — no masks, exact blocks
    l1_ref[...] = jnp.zeros(l1_ref.shape, jnp.float32) + jnp.sum(
        jnp.sqrt(d * d + eps * eps))
    edge_ref[...] = jnp.zeros(edge_ref.shape, jnp.float32)

    @pl.when(c >= 1)                           # channel 0 feeds only the L1 term
    def _():
        bv = bv_ref[...]                       # (H, H) resident in VMEM
        bhr = bhr_ref[...]                     # (W, W) resident in VMEM
        acc = jnp.float32(0.0)
        for b in range(tb):                    # static unroll, tb <= 8
            db = d[b, 0]                       # (H, W)
            t = jnp.dot(db, bhr, preferred_element_type=jnp.float32)
            f2 = jnp.dot(bv, t, preferred_element_type=jnp.float32)
            lap = db - f2
            acc = acc + jnp.sum(jnp.sqrt(lap * lap + eps * eps))
        edge_ref[...] = jnp.zeros(edge_ref.shape, jnp.float32) + acc


# ------------------------------ host wrapper -------------------------------- #

def edge_l1_loss(x, y, eps=EPS):
    """EdgeL1Loss.forward: charbonnier(x, y) + 0.1 * edge(x[:, 1:], y[:, 1:])."""
    N, C, H, W = x.shape
    bv_np, bhr_np = _laplacian_operators(H, W)
    bv = jnp.asarray(bv_np)
    bhr = jnp.asarray(bhr_np)

    tb = _pick_tb(N, H * W * jnp.dtype(x.dtype).itemsize)
    gn = N // tb

    kernel = functools.partial(_fused_kernel, eps=eps, tb=tb)
    l1_part, edge_part = pl.pallas_call(
        kernel,
        out_shape=(jax.ShapeDtypeStruct((gn, C, 1, 128), jnp.float32),
                   jax.ShapeDtypeStruct((gn, C, 1, 128), jnp.float32)),
        grid=(gn, C),
        in_specs=[
            pl.BlockSpec((tb, 1, H, W), lambda nb, c: (nb, c, 0, 0)),
            pl.BlockSpec((tb, 1, H, W), lambda nb, c: (nb, c, 0, 0)),
            pl.BlockSpec((H, H), lambda nb, c: (0, 0)),   # Bv: resident, no re-DMA
            pl.BlockSpec((W, W), lambda nb, c: (0, 0)),   # Bhr: resident, no re-DMA
        ],
        out_specs=(
            pl.BlockSpec((1, 1, 1, 128), lambda nb, c: (nb, c, 0, 0)),
            pl.BlockSpec((1, 1, 1, 128), lambda nb, c: (nb, c, 0, 0)),
        ),
        compiler_params=pltpu.CompilerParams(
            dimension_semantics=("parallel", "parallel"),
            vmem_limit_bytes=_VMEM_LIMIT_BYTES),
    )(x, y, bv, bhr)

    l1 = jnp.sum(l1_part[:, :, 0, 0]) / (N * C * H * W)
    if C > 1:
        edge = jnp.sum(edge_part[:, :, 0, 0]) / (N * (C - 1) * H * W)
    else:
        edge = jnp.float32(0.0)
    return l1 + 0.1 * edge


# ------------------------------ pure-JAX ref -------------------------------- #

def _ref_conv_gauss(img):
    gk = jnp.array(_GK, jnp.float32)
    B, H, W = img.shape
    p = jnp.pad(img, ((0, 0), (2, 2), (2, 2)), mode="edge")
    out = jnp.zeros_like(img)
    for i in range(5):
        for j in range(5):
            out = out + gk[i, j] * p[:, i:i + H, j:j + W]
    return out


def _ref_loss(x, y):
    def charb(a, b):
        d = a - b
        return jnp.mean(jnp.sqrt(d * d + EPS * EPS))

    def lap(cur):
        N, C, H, W = cur.shape
        flat = cur.reshape(N * C, H, W)
        f1 = _ref_conv_gauss(flat)
        hh = jnp.arange(H)[:, None]
        ww = jnp.arange(W)[None, :]
        mask = ((hh % 2 == 0) & (ww % 2 == 0)).astype(jnp.float32)
        nf = f1 * 4.0 * mask[None]
        f2 = _ref_conv_gauss(nf)
        return (flat - f2).reshape(N, C, H, W)

    l1 = charb(x, y)
    edge = charb(lap(x[:, 1:]), lap(y[:, 1:]))
    return l1 + 0.1 * edge


if __name__ == "__main__":
    key = jax.random.PRNGKey(0)
    kx, ky = jax.random.split(key)
    x = jax.random.normal(kx, (2, 4, 16, 16), dtype=jnp.float32)
    y = jax.random.normal(ky, (2, 4, 16, 16), dtype=jnp.float32)

    loss_fn = jax.jit(edge_l1_loss)
    out = jax.block_until_ready(loss_fn(x, y))

    ref = _ref_loss(x, y)
    # 1e-4 tolerance covers MXU operand rounding of the (mathematically exact)
    # banded-operator reformulation; real bugs are orders of magnitude larger.
    assert jnp.allclose(out, ref, rtol=1e-4, atol=1e-4), (float(out), float(ref))
    print("KERNEL_OK")
</pallas_src>

<mosaic_0001>
module attributes {stable_mosaic.version = 11 : i64} {
  func.func @_fused_kernel(%arg0: i32, %arg1: i32, %arg2: memref<2x1x16x16xf32, #tpu.memory_space<vmem>>, %arg3: memref<2x1x16x16xf32, #tpu.memory_space<vmem>>, %arg4: memref<16x16xf32, #tpu.memory_space<vmem>>, %arg5: memref<16x16xf32, #tpu.memory_space<vmem>>, %arg6: memref<1x1x1x128xf32, #tpu.memory_space<vmem>>, %arg7: memref<1x1x1x128xf32, #tpu.memory_space<vmem>>) attributes {dimension_semantics = [#tpu.dimension_semantics<parallel>, #tpu.dimension_semantics<parallel>], iteration_bounds = array<i64: 1, 4>, scalar_prefetch = 0 : i64, scratch_operands = 0 : i64, tpu.core_type = #tpu.core_type<tc>, window_params = [{transform_indices = @transform_0, window_bounds = array<i64: 2, 1, 16, 16>}, {transform_indices = @transform_1, window_bounds = array<i64: 2, 1, 16, 16>}, {pipeline_mode = #tpu.pipeline_mode<synchronous>, transform_indices = @transform_2, window_bounds = array<i64: 16, 16>}, {pipeline_mode = #tpu.pipeline_mode<synchronous>, transform_indices = @transform_3, window_bounds = array<i64: 16, 16>}, {transform_indices = @transform_4, window_bounds = array<i64: 1, 1, 1, 128>}, {transform_indices = @transform_5, window_bounds = array<i64: 1, 1, 1, 128>}]} {
    %c0 = arith.constant 0 : index
    %c0_0 = arith.constant 0 : index
    %c0_1 = arith.constant 0 : index
    %c0_2 = arith.constant 0 : index
    %0 = vector.load %arg2[%c0, %c0_0, %c0_1, %c0_2] : memref<2x1x16x16xf32, #tpu.memory_space<vmem>>, vector<2x1x16x16xf32>
    %c0_3 = arith.constant 0 : index
    %c0_4 = arith.constant 0 : index
    %c0_5 = arith.constant 0 : index
    %c0_6 = arith.constant 0 : index
    %1 = vector.load %arg3[%c0_3, %c0_4, %c0_5, %c0_6] : memref<2x1x16x16xf32, #tpu.memory_space<vmem>>, vector<2x1x16x16xf32>
    %2 = arith.subf %0, %1 : vector<2x1x16x16xf32>
    %cst = arith.constant 0.000000e+00 : f32
    %3 = vector.broadcast %cst : f32 to vector<1x1x1x128xf32>
    %4 = arith.mulf %2, %2 : vector<2x1x16x16xf32>
    %cst_7 = arith.constant 9.99999997E-7 : f32
    %5 = vector.broadcast %cst_7 : f32 to vector<2x1x16x16xf32>
    %6 = arith.addf %4, %5 : vector<2x1x16x16xf32>
    %7 = math.sqrt %6 : vector<2x1x16x16xf32>
    %8 = vector.shape_cast %7 : vector<2x1x16x16xf32> to vector<1x2x1x16x16xf32>
    %cst_8 = arith.constant dense<0.000000e+00> : vector<1xf32>
    %9 = vector.multi_reduction <add>, %8, %cst_8 [1, 2, 3, 4] : vector<1x2x1x16x16xf32> to vector<1xf32>
    %10 = vector.shape_cast %9 : vector<1xf32> to vector<1x1x1x1x1xf32>
    %11 = vector.extract %10[0, 0, 0, 0, 0] : f32 from vector<1x1x1x1x1xf32>
    %12 = vector.broadcast %11 : f32 to vector<1x1x1x128xf32>
    %13 = arith.addf %3, %12 : vector<1x1x1x128xf32>
    %c0_9 = arith.constant 0 : index
    %c0_10 = arith.constant 0 : index
    %c0_11 = arith.constant 0 : index
    %c0_12 = arith.constant 0 : index
    %14 = vector.load %arg6[%c0_9, %c0_10, %c0_11, %c0_12] : memref<1x1x1x128xf32, #tpu.memory_space<vmem>>, vector<1x1x1x128xf32>
    tpu.vector_store %arg6[%c0_9, %c0_10, %c0_11, %c0_12], %13 {strides = array<i32>} : memref<1x1x1x128xf32, #tpu.memory_space<vmem>>, vector<1x1x1x128xf32>,
    %cst_13 = arith.constant 0.000000e+00 : f32
    %15 = vector.broadcast %cst_13 : f32 to vector<1x1x1x128xf32>
    %c0_14 = arith.constant 0 : index
    %c0_15 = arith.constant 0 : index
    %c0_16 = arith.constant 0 : index
    %c0_17 = arith.constant 0 : index
    %16 = vector.load %arg7[%c0_14, %c0_15, %c0_16, %c0_17] : memref<1x1x1x128xf32, #tpu.memory_space<vmem>>, vector<1x1x1x128xf32>
    tpu.vector_store %arg7[%c0_14, %c0_15, %c0_16, %c0_17], %15 {strides = array<i32>} : memref<1x1x1x128xf32, #tpu.memory_space<vmem>>, vector<1x1x1x128xf32>,
    %c1_i32 = arith.constant 1 : i32
    %17 = arith.cmpi sge, %arg1, %c1_i32 : i32
    %18 = arith.extui %17 : i1 to i32
    %c0_i32 = arith.constant 0 : i32
    %19 = arith.cmpi ne, %18, %c0_i32 : i32
    scf.if %19 {
      %c0_18 = arith.constant 0 : index
      %c0_19 = arith.constant 0 : index
      %20 = vector.load %arg4[%c0_18, %c0_19] : memref<16x16xf32, #tpu.memory_space<vmem>>, vector<16x16xf32>
      %c0_20 = arith.constant 0 : index
      %c0_21 = arith.constant 0 : index
      %21 = vector.load %arg5[%c0_20, %c0_21] : memref<16x16xf32, #tpu.memory_space<vmem>>, vector<16x16xf32>
      %22 = vector.extract_strided_slice %2 {offsets = [0, 0, 0, 0], sizes = [1, 1, 16, 16], strides = [1, 1, 1, 1]} : vector<2x1x16x16xf32> to vector<1x1x16x16xf32>
      %23 = vector.shape_cast %22 : vector<1x1x16x16xf32> to vector<16x16xf32>
      %cst_22 = arith.constant dense<0.000000e+00> : vector<16x16xf32>
      %24 = tpu.matmul %23, %21, %cst_22 {dimension_numbers = #tpu.dot_dimension_numbers<[1], [0], [0], [1], [0, 0, 1, 1], [], []>} : vector<16x16xf32>, vector<16x16xf32>, vector<16x16xf32> -> vector<16x16xf32>
      %cst_23 = arith.constant dense<0.000000e+00> : vector<16x16xf32>
      %25 = tpu.matmul %20, %24, %cst_23 {dimension_numbers = #tpu.dot_dimension_numbers<[1], [0], [0], [1], [0, 0, 1, 1], [], []>} : vector<16x16xf32>, vector<16x16xf32>, vector<16x16xf32> -> vector<16x16xf32>
      %26 = arith.subf %23, %25 : vector<16x16xf32>
      %27 = arith.mulf %26, %26 : vector<16x16xf32>
      %cst_24 = arith.constant 9.99999997E-7 : f32
      %28 = vector.broadcast %cst_24 : f32 to vector<16x16xf32>
      %29 = arith.addf %27, %28 : vector<16x16xf32>
      %30 = math.sqrt %29 : vector<16x16xf32>
      %31 = vector.shape_cast %30 : vector<16x16xf32> to vector<1x16x16xf32>
      %cst_25 = arith.constant dense<0.000000e+00> : vector<1xf32>
      %32 = vector.multi_reduction <add>, %31, %cst_25 [1, 2] : vector<1x16x16xf32> to vector<1xf32>
      %33 = vector.shape_cast %32 : vector<1xf32> to vector<1x1x1xf32>
      %34 = vector.extract %33[0, 0, 0] : f32 from vector<1x1x1xf32>
      %cst_26 = arith.constant 0.000000e+00 : f32
      %35 = arith.addf %cst_26, %34 : f32
      %36 = vector.extract_strided_slice %2 {offsets = [1, 0, 0, 0], sizes = [1, 1, 16, 16], strides = [1, 1, 1, 1]} : vector<2x1x16x16xf32> to vector<1x1x16x16xf32>
      %37 = vector.shape_cast %36 : vector<1x1x16x16xf32> to vector<16x16xf32>
      %cst_27 = arith.constant dense<0.000000e+00> : vector<16x16xf32>
      %38 = tpu.matmul %37, %21, %cst_27 {dimension_numbers = #tpu.dot_dimension_numbers<[1], [0], [0], [1], [0, 0, 1, 1], [], []>} : vector<16x16xf32>, vector<16x16xf32>, vector<16x16xf32> -> vector<16x16xf32>
      %cst_28 = arith.constant dense<0.000000e+00> : vector<16x16xf32>
      %39 = tpu.matmul %20, %38, %cst_28 {dimension_numbers = #tpu.dot_dimension_numbers<[1], [0], [0], [1], [0, 0, 1, 1], [], []>} : vector<16x16xf32>, vector<16x16xf32>, vector<16x16xf32> -> vector<16x16xf32>
      %40 = arith.subf %37, %39 : vector<16x16xf32>
      %41 = arith.mulf %40, %40 : vector<16x16xf32>
      %cst_29 = arith.constant 9.99999997E-7 : f32
      %42 = vector.broadcast %cst_29 : f32 to vector<16x16xf32>
      %43 = arith.addf %41, %42 : vector<16x16xf32>
      %44 = math.sqrt %43 : vector<16x16xf32>
      %45 = vector.shape_cast %44 : vector<16x16xf32> to vector<1x16x16xf32>
      %cst_30 = arith.constant dense<0.000000e+00> : vector<1xf32>
      %46 = vector.multi_reduction <add>, %45, %cst_30 [1, 2] : vector<1x16x16xf32> to vector<1xf32>
      %47 = vector.shape_cast %46 : vector<1xf32> to vector<1x1x1xf32>
      %48 = vector.extract %47[0, 0, 0] : f32 from vector<1x1x1xf32>
      %49 = arith.addf %35, %48 : f32
      %cst_31 = arith.constant 0.000000e+00 : f32
      %50 = vector.broadcast %cst_31 : f32 to vector<1x1x1x128xf32>
      %51 = vector.broadcast %49 : f32 to vector<1x1x1x128xf32>
      %52 = arith.addf %50, %51 : vector<1x1x1x128xf32>
      %c0_32 = arith.constant 0 : index
      %c0_33 = arith.constant 0 : index
      %c0_34 = arith.constant 0 : index
      %c0_35 = arith.constant 0 : index
      %53 = vector.load %arg7[%c0_32, %c0_33, %c0_34, %c0_35] : memref<1x1x1x128xf32, #tpu.memory_space<vmem>>, vector<1x1x1x128xf32>
      tpu.vector_store %arg7[%c0_32, %c0_33, %c0_34, %c0_35], %52 {strides = array<i32>} : memref<1x1x1x128xf32, #tpu.memory_space<vmem>>, vector<1x1x1x128xf32>,
    } else {
    }
    return
  }
  func.func @transform_0(%arg0: i32, %arg1: i32) -> (i32, i32, i32, i32) {
    %c0_i32 = arith.constant 0 : i32
    %c0_i32_0 = arith.constant 0 : i32
    %c0_i32_1 = arith.constant 0 : i32
    return %arg0, %arg1, %c0_i32, %c0_i32_0 : i32, i32, i32, i32
  }
  func.func @transform_1(%arg0: i32, %arg1: i32) -> (i32, i32, i32, i32) {
    %c0_i32 = arith.constant 0 : i32
    %c0_i32_0 = arith.constant 0 : i32
    %c0_i32_1 = arith.constant 0 : i32
    return %arg0, %arg1, %c0_i32, %c0_i32_0 : i32, i32, i32, i32
  }
  func.func @transform_2(%arg0: i32, %arg1: i32) -> (i32, i32) {
    %c0_i32 = arith.constant 0 : i32
    %c0_i32_0 = arith.constant 0 : i32
    %c0_i32_1 = arith.constant 0 : i32
    return %c0_i32, %c0_i32_0 : i32, i32
  }
  func.func @transform_3(%arg0: i32, %arg1: i32) -> (i32, i32) {
    %c0_i32 = arith.constant 0 : i32
    %c0_i32_0 = arith.constant 0 : i32
    %c0_i32_1 = arith.constant 0 : i32
    return %c0_i32, %c0_i32_0 : i32, i32
  }
  func.func @transform_4(%arg0: i32, %arg1: i32) -> (i32, i32, i32, i32) {
    %c0_i32 = arith.constant 0 : i32
    %c0_i32_0 = arith.constant 0 : i32
    %c0_i32_1 = arith.constant 0 : i32
    return %arg0, %arg1, %c0_i32, %c0_i32_0 : i32, i32, i32, i32
  }
  func.func @transform_5(%arg0: i32, %arg1: i32) -> (i32, i32, i32, i32) {
    %c0_i32 = arith.constant 0 : i32
    %c0_i32_0 = arith.constant 0 : i32
    %c0_i32_1 = arith.constant 0 : i32
    return %arg0, %arg1, %c0_i32, %c0_i32_0 : i32, i32, i32, i32
  }
}

</mosaic_0001>

<bundles_post_ra>
// kernel: edge_l1_loss.1
= control target key start
LH: loop header
LB: loop body
LE: loop exit
PB: predicated region body
PF: predicated region fallthrough
CT: control target
= control target key end

     0   :  { %s1590_s0 = inlined_call_operand.hbm [shape: f32[2,4,16,16], index: 0, kind: input, shape index: {}]   ;;  %s1591_s1 = inlined_call_operand.hbm [shape: f32[2,4,16,16], index: 1, kind: input, shape index: {}]   ;;  %s1592_s2 = inlined_call_operand.hbm [shape: f32[16,16], index: 2, kind: input, shape index: {}]   ;;  %s1593_s3 = inlined_call_operand.vmem [shape: f32[16,16], index: 3, kind: input, shape index: {}]   ;;  %s1594_s4 = inlined_call_operand.vmem [shape: f32[1,4,1,128], index: 4, kind: output, shape index: {0}]   ;;  %s1595_s5 = inlined_call_operand.vmem [shape: f32[1,4,1,128], index: 5, kind: output, shape index: {1}]  }
   0x1   :  { %1602 = sst [smem:[#allocation16_spill]] %s1590_s0 }
   0x2   :  { %11 = vsyncpa [#allocation3], 0 }
   0x3   :  { %13 = vsyncpa [#allocation3 + $0x1], 0 }
   0x4   :  { %14 = vsyncpa [#allocation5], 0 }
   0x5   :  { %16 = vsyncpa [#allocation5 + $0x1], 0  ;;  %s1364_s18 = smov 0   ;;  %s1366_s19 = smov 0  }
   0x6   :  { %s1368_s20 = smov 0   ;;  %s1370_s21 = smov 0  }
   0x7   :  { %s1372_s22 = smov 0   ;;  %s1374_s23 = smov 0  }
   0x8 LB: > { %s1601_s24 = sadd.s32 4294967295, %s1316_s23   ;;  %s31_s25 = sadd.s32 1, %s1312_s22  ;;  %s1316_s23 = sphi %s1374_s23, %s22_s23   ;;  %s1312_s22 = sphi %s1372_s22, %s1618_s22   ;;  %s1308_s21 = sphi %s1370_s21, %s1617_s21   ;;  %s1304_s20 = sphi %s1368_s20, %s1616_s20   ;;  %s1300_s19 = sphi %s1366_s19, %s1615_s19   ;;  %s1296_s18 = sphi %s1364_s18, %s1614_s18  }
   0x9   : > { %p32_p0 = scmp.ge.s32.totalorder %s31_s25, 4  ;;  %s43_s26 = sadd.s32 1, %s1304_s20 }
   0xa   : > { %p50_p1 = scmp.ne.s32.totalorder %s1304_s20, %s1300_s19  ;;  %p51_p2 = scmp.eq.s32.totalorder %s1316_s23, 0 }
   0xb   : > { %s1620_s25 = smov (%p32_p0, %s31_s25), 0  ;;  %p56_p4 = scmp.ne.s32.totalorder %s1300_s19, %s1296_s18 }
   0xc   : > { %p1400_p3 = por %p51_p2, %p50_p1  ;;  %s39_s28 = ssub.s32 %s1312_s22, %s1620_s25 }
   0xd   : > { %p1409_p5 = scmp.eq.s32.totalorder %s1601_s24, 0  ;;  %p41_p6 = scmp.eq.s32.totalorder %s39_s28, 0 }
   0xe   : > { %s1603_s27 = scalar_select %p1400_p3, 1, 0 }
   0xf   : > { %s1604_s29 = scalar_select %p1409_p5, 1, 0 }
  0x10   : > { %p1026_p7 = scmp.ge.s32.totalorder %s1316_s23, 1  ;;  %p1416_p8 = por %p1409_p5, %p56_p4 }
  0x11   : > { %p193_p9 = scmp.lt.s32.totalorder %s1316_s23, 5  ;;  %s1318_s8 = smov [#allocation6]  }
  0x12   : > { %s1605_s30 = scalar_select %p1416_p8, 1, 0 }
  0x13   : > { %s1422_s6 = scalar_select %p41_p6, %s1304_s20, %s43_s26  }
  0x14   : > { %p1424_p10 = pnand %p1026_p7, %p193_p9  ;;  %s205_s9 = sshll.u32 %s1318_s8, 4  ;;  %s206_s9 = int_to_ptr.vmem [resolvable:$true] %s205_s9 }
  0x15   : > { %s1230_s13 = scalar_lea.hbm %s1592_s2, 256 }
  0x16   : > { %s1606_s7 = scalar_select %p1424_p10, 1, 0 }
  0x17   : > { %p1144_p11 = pneg %p1424_p10  ;;  %p1231_p13 = scmp.ne.s32.totalorder %s1592_s2, %s1230_s13 }
  0x18   : > { %p1237_p4 = scmp.lt.u32.totalorder %s1230_s13, %s1592_s2 }
  0x19   : > { %p1432_p12 = pnand %p1144_p11, %p1409_p5 }
  0x1b   : > { %p1232_p0 = pneg %p1432_p12 }
  0x1d   : > { %p1233_p1 = pnand %p1232_p0, %p1231_p13 }
  0x1f   : > { %p1234_p2 = pneg %p1233_p1 }
  0x21   : > { %p1239_p6 = pnand %p1237_p4, %p1234_p2 }
  0x23   : > { %1242 = shalt.err (!%p1239_p6)
}
  0x24   : > { %s1243_s18 = scalar_lea.vmem %s206_s9, 256  ;;  %p1251_p5 = scmp.lt.s32.totalorder %s206_s9, %s206_s9 }
  0x25   : > { %p1244_p7 = scmp.ne.s32.totalorder %s206_s9, %s1243_s18  ;;  %p1252_p8 = scmp.lt.s32.totalorder %s1243_s18, %s1243_s18 }
  0x27   : > { %p1246_p9 = pnand %p1244_p7, %p1232_p0  ;;  %p1253_p10 = por %p1252_p8, %p1251_p5 }
  0x29   : > { %p1247_p11 = pneg %p1246_p9 }
  0x2b   : > { %p1254_p3 = pnand %p1253_p10, %p1247_p11 }
  0x2d   : > { %1257 = shalt.err (!%p1254_p3)
}
  0x2e   : > { %s1319_s26 = smov 128   ;;  %s1320_s28 = smov 8  }
  0x2f   : > { %1147 = dma.hbm_to_vmem [thread:$0]  (!%p1432_p12), %s1592_s2, 256, %s206_s9, [#allocation5], %s1319_s26, %s1319_s26, %s1320_s28  }
  0x30   : > { %p1028_p13 = scmp.ge.s32.totalorder %s1316_s23, 4 }
  0x32   : > { %218 = sbr.rel (%p1028_p13) target bundleno = 84 (0x54), region = 24 }
  0x39   : > { %s222_s12 = sand.u32 1, %s1304_s20   ;;  %s1054_s13 = sshll.u32 %s1312_s22, 8 }
  0x3a   : > { %s1029_s14 = sshll.u32 %s222_s12, 5  ;;  %s1608_s0 = sld [smem:[#allocation16_spill]] }
  0x3b   : > { %p1609_p3 = scmp.ne.s32.totalorder %s1603_s27, 0  ;;  %s226_s17 = scalar_lea.vmem [#allocation2], %s1029_s14 }
  0x3c   : > { %s248_s18 = sshll.u32 %s226_s17, 4  ;;  %s1321_s28 = smov 1024   ;;  %s249_s18 = int_to_ptr.vmem [resolvable:$true] %s248_s18 }
  0x3d   : > { %s1124_s9 = scalar_select %p1609_p3, [#allocation0], [#allocation11] }
  0x3e   : > { %1125 = sst [smem:[#allocation8]] (%p1609_p3), %s1321_s28  ;;  %s1322_s8 = smov 256  }
  0x3f   : > { %s240_s26 = sld [smem:[%s1124_s9]]   ;;  %s1323_s11 = smov 2  }
  0x40   : > { %s235_s16 = scalar_lea.hbm %s1608_s0, %s1054_s13  ;;  %1126 = sst [smem:[#allocation8 + $0x1]] (%p1609_p3), %s1322_s8 }
  0x41   : > { %1127 = sst [smem:[#allocation8 + $0x2]] (%p1609_p3), %s1323_s11  ;;  %s1324_s24 = smov 128  }
  0x42   : > { %1128 = sst [smem:[#allocation8 + $0x3]] (%p1609_p3), %s1324_s24  ;;  %s1325_s10 = smov 8  }
  0x43   : > { %1129 = sst [smem:[#allocation8 + $0x4]] (%p1609_p3), %s1324_s24  ;;  %s223_s17 = scalar_lea.sflag [#allocation3], %s222_s12 }
  0x44   : > { %1130 = sst [smem:[#allocation8 + $0x5]] (%p1609_p3), %s1325_s10  ;;  %s1326_s0 = smov [#allocation7]  }
  0x45   : > { %s1032_s15 = sshll.u32 %s240_s26, 26 }
  0x46   : > { %s1033_s9 = sadd.s32 134217728, %s1032_s15 }
  0x47   : > { %1131 = dma.general (%p1609_p3), %s235_s16, 512, %s249_s18, %s223_s17, %s1326_s0, [#allocation8], %s1033_s9, 0  }
  0x48   : > { %s271_s28 = sand.u32 1, %s1316_s23   ;;  %s284_s24 = scalar_lea.hbm %s1591_s1, %s1054_s13 }
  0x49   : > { %s1132_s26 = scalar_select %p1609_p3, [#allocation0], [#allocation12] }
  0x4a   : > { %s275_s15 = scalar_lea.vmem [#allocation4], %s1029_s14  ;;  %s1327_s0 = smov 1024  }
  0x4b   : > { %s297_s12 = sshll.u32 %s275_s15, 4  ;;  %s289_s10 = sld [smem:[%s1132_s26]]   ;;  %s298_s12 = int_to_ptr.vmem [resolvable:$true] %s297_s12 }
  0x4c   : > { %1133 = sst [smem:[#allocation10]] (%p1609_p3), %s1327_s0  ;;  %s1328_s16 = smov 256  }
  0x4d   : > { %1134 = sst [smem:[#allocation10 + $0x1]] (%p1609_p3), %s1328_s16  ;;  %s1329_s18 = smov 2  }
  0x4e   : > { %1135 = sst [smem:[#allocation10 + $0x2]] (%p1609_p3), %s1329_s18  ;;  %s1330_s9 = smov 128  }
  0x4f   : > { %1136 = sst [smem:[#allocation10 + $0x3]] (%p1609_p3), %s1330_s9  ;;  %s1331_s14 = smov 8  }
  0x50   : > { %1137 = sst [smem:[#allocation10 + $0x4]] (%p1609_p3), %s1330_s9  ;;  %s272_s8 = scalar_lea.sflag [#allocation5], %s271_s28 }
  0x51   : > { %s1037_s13 = sshll.u32 %s289_s10, 26  ;;  %1138 = sst [smem:[#allocation10 + $0x5]] (%p1609_p3), %s1331_s14 }
  0x52   : > { %s1038_s17 = sadd.s32 134217728, %s1037_s13  ;;  %s1332_s11 = smov [#allocation9]  }
  0x53   : > { %1139 = dma.general (%p1609_p3), %s284_s24, 512, %s298_s12, %s272_s8, %s1332_s11, [#allocation10], %s1038_s17, 0  }
  0x54 PF: > { %p1610_p5 = scmp.ne.s32.totalorder %s1606_s7, 0 }
  0x55   : > { %s324_s26 = sand.u32 (!%p1610_p5), 1, %s1300_s19   ;;  %p1611_p8 = scmp.ne.s32.totalorder (!%p1610_p5), %s1605_s30, 0 }
  0x56   : > { %322 = sbr.rel (%p1610_p5) target bundleno = 779 (0x30b), region = 36  ;;  %s1040_s15 = sshll.u32 (!%p1610_p5), %s324_s26, 5 }
  0x57   : > { %s325_s0 = scalar_lea.sflag (!%p1610_p5), [#allocation3], %s324_s26  ;;  %s328_s16 = scalar_lea.vmem (!%p1610_p5), [#allocation2], %s1040_s15 }
  0x5d   : > { %1283 = dma.done.wait (%p1611_p8), %s325_s0, 512  }
  0x5e   : > { %1285 = vsyncadd (%p1611_p8), %s325_s0, 4294966784  ;;  %s1612_s28 = sadd.s32 4294967295, %s1316_s23   ;;  %s337_s12 = scalar_lea.vmem [#allocation4], %s1040_s15 }
  0x5f   : > { %s333_s27 = sand.u32 1, %s1612_s28  }
  0x60   : > { %s334_s24 = scalar_lea.sflag [#allocation5], %s333_s27 }
  0x61   : > { %1287 = dma.done.wait (%p1611_p8), %s334_s24, 512  }
  0x62   : > { %1289 = vsyncadd (%p1611_p8), %s334_s24, 4294966784  ;;  %p1613_p10 = scmp.ne.s32.totalorder %s1604_s29, 0 }
  0x64   : > { %1291 = dma.done.wait (%p1613_p10), [#allocation5], 256  }
  0x65   : > { %1293 = vsyncadd (%p1613_p10), [#allocation5], 4294967040  ;;  %v398_v0 = vld [vmem:[%s328_s16] sm:$0xff]  ;;  %v399_v1 = vld [vmem:[%s328_s16 + $0x8] sm:$0xff]  ;;  %vm446_vm2 = vcmask 130048   ;;  %p386_p12 = scmp.lt.s32.totalorder %s1308_s21, 3 }
  0x66   : > { %v400_v2 = vld [vmem:[%s328_s16 + $0x10] sm:$0xff]  ;;  %v401_v3 = vld [vmem:[%s328_s16 + $0x18] sm:$0xff]  ;;  %v402_v4 = vld [vmem:[%s337_s12] sm:$0xff]  ;;  %v1333_v47 = vmov 0.0   ;;  %p1043_p0 = scmp.lt.s32.totalorder %s1308_s21, 1 }
  0x67   : > { %v403_v5 = vld [vmem:[%s337_s12 + $0x8] sm:$0xff]  ;;  %v404_v6 = vld [vmem:[%s337_s12 + $0x10] sm:$0xff]  ;;  %v405_v7 = vld [vmem:[%s337_s12 + $0x18] sm:$0xff]  ;;  %v1511_v8 = vsub.f32 %v398_v0, %v402_v4  ;;  %s387_s29 = scalar_select %p386_p12, %s1308_s21, 3 }
  0x68   : > { %v1513_v9 = vsub.f32 %v399_v1, %v403_v5  ;;  %v1515_v10 = vsub.f32 %v400_v2, %v404_v6  ;;  %v1517_v11 = vsub.f32 %v401_v3, %v405_v7  ;;  %v473_v56 = vld [vmem:[%s1593_s3] sm:$0xff] (!%p1043_p0)  ;;  %v474_v57 = vld [vmem:[%s1593_s3 + $0x8] sm:$0xff] (!%p1043_p0) }
  0x69   : > { %v410_v12 = vmul.f32 %v1511_v8, %v1511_v8  ;;  %s1538_s10 = scalar_lea.vmem %s1595_s5, %s387_s29  ;;  %s390_s13 = scalar_lea.vmem %s1594_s4, %s387_s29  ;;  %1076 = vmatprep.mubr.msk.f32.mxu0 (!%p1043_p0), %vm446_vm2, %v1511_v8  ;;  %v1100_v58 = vpack.c.bf16 (!%p1043_p0), %v474_v57, %v473_v56  ;;  %v471_v59 = vld [vmem:[#allocation6] sm:$0xff] (!%p1043_p0)  ;;  %v472_v1 = vld [vmem:[#allocation6 + $0x8] sm:$0xff] (!%p1043_p0) }
  0x6a   : > { %v411_v13 = vmul.f32 %v1513_v9, %v1513_v9  ;;  %v412_v14 = vmul.f32 %v1515_v10, %v1515_v10  ;;  %v413_v15 = vmul.f32 %v1517_v11, %v1517_v11  ;;  %466 = vst [vmem:[%s1538_s10] sm:$0x1] %v1333_v47  ;;  %1083 = vmatprep.mubr.msk.f32.mxu1 (!%p1043_p0), %vm446_vm2, %v471_v59 }
  0x6b   : > { %v414_v16 = vadd.f32 1e-06, %v410_v12  ;;  %1101 = vmatprep.subr.bf16.mxu0 (!%p1043_p0), %v1100_v58 }
  0x6c   : > { %v415_v17 = vadd.f32 1e-06, %v411_v13  ;;  %v416_v18 = vadd.f32 1e-06, %v412_v14  ;;  %v417_v19 = vadd.f32 1e-06, %v413_v15  ;;  %1103 = vmatpush3.bf16.msra.mxu0 (!%p1043_p0), %v1100_v58 }
  0x6d   : > { %1214 = vrsqrt.f32 %v414_v16  ;;  %vm420_vm0 = vcmp.eq.f32.partialorder %v414_v16, inf  ;;  %vm422_vm1 = vcmp.eq.f32.partialorder %v414_v16, 0.0  ;;  %v423_v21 = vand.u32 2147483648, %v414_v16  ;;  %1109 = vmatprep.subr.bf16.mxu0 (!%p1043_p0), %v1100_v58 }
  0x6e   : > { %1216 = vrsqrt.f32 %v415_v17  ;;  %vm427_vm3 = vcmp.eq.f32.partialorder %v415_v17, inf  ;;  %vm429_vm4 = vcmp.eq.f32.partialorder %v415_v17, 0.0  ;;  %v430_v24 = vand.u32 2147483648, %v415_v17 }
  0x6f   : > { %1218 = vrsqrt.f32 %v416_v18  ;;  %vm434_vm5 = vcmp.eq.f32.partialorder %v416_v18, inf  ;;  %vm436_vm6 = vcmp.eq.f32.partialorder %v416_v18, 0.0  ;;  %v437_v27 = vand.u32 2147483648, %v416_v18  ;;  %1077 = vmatmul.mubr.msk.f32.vlgmr.msra.gmra.mrb[0].mxu0 (!%p1043_p0), %vm446_vm2, %v1513_v9 }
  0x70   : > { %1220 = vrsqrt.f32 %v417_v19  ;;  %vm441_vm7 = vcmp.eq.f32.partialorder %v417_v19, inf  ;;  %v444_v31 = vand.u32 2147483648, %v417_v19  ;;  %vm443_vm8 = vcmp.eq.f32.partialorder %v417_v19, 0.0  ;;  %1111 = vmatpush3.bf16.msra.mxu0 (!%p1043_p0), %v1100_v58  ;;  %1090 = vmatprep.mubr.msk.f32.mxu0 (!%p1043_p0), %vm446_vm2, %v1515_v10 }
  0x73   : > { %1091 = vmatmul.mubr.msk.f32.vlgmr.msra.gmra.mrb[2].mxu0 (!%p1043_p0), %vm446_vm2, %v1517_v11 }
  0x77   : > { %v1215_v20 = vpop.eup %1214 }
  0x78   : > { %v1217_v22 = vpop.eup %1216  ;;  %v419_v23 = vmul.f32 %v1215_v20, %v414_v16 }
  0x79   : > { %v1219_v25 = vpop.eup %1218  ;;  %v426_v26 = vmul.f32 %v1217_v22, %v415_v17 }
  0x7a   : > { %v1221_v28 = vpop.eup %1220  ;;  %v421_v29 = vsel %vm420_vm0, %v414_v16, %v419_v23  ;;  %v433_v30 = vmul.f32 %v1219_v25, %v416_v18 }
  0x7b   : > { %v424_v32 = vsel %vm422_vm1, %v423_v21, %v421_v29  ;;  %v428_v33 = vsel %vm427_vm3, %v415_v17, %v426_v26  ;;  %v440_v34 = vmul.f32 %v1221_v28, %v417_v19 }
  0x7c   : > { %v431_v35 = vsel %vm429_vm4, %v430_v24, %v428_v33  ;;  %v435_v36 = vsel %vm434_vm5, %v416_v18, %v433_v30  ;;  %v447_v37 = vsel %vm446_vm2, %v424_v32, 0.0 }
  0x7d   : > { %v438_v38 = vsel %vm436_vm6, %v437_v27, %v435_v36  ;;  %v442_v39 = vsel %vm441_vm7, %v417_v19, %v440_v34  ;;  %v448_v40 = vsel %vm446_vm2, %v431_v35, 0.0 }
  0x7e   : > { %v445_v41 = vsel %vm443_vm8, %v444_v31, %v442_v39  ;;  %v449_v42 = vadd.f32 %v448_v40, %v447_v37  ;;  %v450_v43 = vsel %vm446_vm2, %v438_v38, 0.0 }
  0x7f   : > { %v452_v44 = vsel %vm446_vm2, %v445_v41, 0.0 }
  0x80   : > { %v451_v45 = vadd.f32 %v450_v43, %v449_v42 }
  0x82   : > { %v453_v46 = vadd.f32 %v452_v44, %v451_v45 }
  0x84   : > { %454 = vadd.xlane.f32.xlu0 %v453_v46 }
 0x111   : > { %v455_v48 = vpop.xlane.xlu0 %454 }
 0x112   : > { %v456_v49 = vrot.slane %v455_v48, 4 }
 0x114   : > { %v457_v50 = vadd.f32 %v456_v49, %v455_v48 }
 0x116   : > { %v458_v51 = vrot.slane %v457_v50, 2 }
 0x118   : > { %v459_v52 = vadd.f32 %v458_v51, %v457_v50 }
 0x11a   : > { %v460_v53 = vrot.slane %v459_v52, 1 }
 0x11c   : > { %v461_v54 = vadd.f32 %v460_v53, %v459_v52 }
 0x11e   : > { %1116 = vpush %v461_v54 }
 0x142   : > { %v1078_v60 = vpop.f32.mrb[0].mxu0 (!%p1043_p0) }
 0x143   : > { %v547_v61 = vpop.f32.mrb[1].mxu0 (!%p1043_p0) }
 0x144   : > { %v1104_v62 = vpack.c.bf16 (!%p1043_p0), %v1078_v60, %v547_v61 }
 0x146   : > { %1105 = vmatprep.subr.bf16.mxu1 (!%p1043_p0), %v1104_v62  ;;  %v1092_v63 = vpop.f32.mrb[2].mxu0 (!%p1043_p0) }
 0x147   : > { %1107 = vmatpush3.bf16.msra.mxu1 (!%p1043_p0), %v1104_v62  ;;  %v742_v0 = vpop.f32.mrb[3].mxu0 (!%p1043_p0) }
 0x148   : > { %v1112_v2 = vpack.c.bf16 (!%p1043_p0), %v1092_v63, %v742_v0 }
 0x14a   : > { %1084 = vmatmul.mubr.msk.f32.vlgmr.msra.gmra.mrb[0].mxu1 (!%p1043_p0), %vm446_vm2, %v472_v1  ;;  %1113 = vmatprep.subr.bf16.mxu1 (!%p1043_p0), %v1112_v2 }
 0x14b   : > { %470 = sbr.rel (%p1043_p0) target bundleno = 779 (0x30b), region = 52  ;;  %1115 = vmatpush3.bf16.msra.mxu1 (!%p1043_p0), %v1112_v2  ;;  %1097 = vmatprep.mubr.msk.f32.mxu1 (!%p1043_p0), %vm446_vm2, %v471_v59 }
 0x14e   : > { %1098 = vmatmul.mubr.msk.f32.vlgmr.msra.gmra.mrb[2].mxu1 (!%p1043_p0), %vm446_vm2, %v472_v1 }
 0x14f   : > { %s1117_s14 = spop %1116 }
 0x150   : > { %v463_v55 = vstv %s1117_s14 }
 0x151   : > { %465 = vst [vmem:[%s390_s13] sm:$0x1] %v463_v55 }
 0x21d   : > { %v1085_v3 = vpop.f32.mrb[0].mxu1 }
 0x21e   : > { %v638_v4 = vsub.f32 %v1513_v9, %v1085_v3  ;;  %v628_v5 = vpop.f32.mrb[1].mxu1 }
 0x21f   : > { %v637_v6 = vsub.f32 %v1511_v8, %v628_v5 }
 0x220   : > { %v640_v7 = vmul.f32 %v638_v4, %v638_v4 }
 0x221   : > { %v639_v12 = vmul.f32 %v637_v6, %v637_v6  ;;  %v1099_v13 = vpop.f32.mrb[2].mxu1 }
 0x222   : > { %v642_v14 = vadd.f32 1e-06, %v640_v7  ;;  %v827_v15 = vsub.f32 %v1517_v11, %v1099_v13  ;;  %v817_v16 = vpop.f32.mrb[3].mxu1 }
 0x223   : > { %v641_v17 = vadd.f32 1e-06, %v639_v12  ;;  %v826_v18 = vsub.f32 %v1515_v10, %v817_v16 }
 0x224   : > { %v829_v19 = vmul.f32 %v827_v15, %v827_v15  ;;  %1222 = vrsqrt.f32 %v642_v14  ;;  %vm652_vm9 = vcmp.eq.f32.partialorder %v642_v14, inf  ;;  %v655_v25 = vand.u32 2147483648, %v642_v14 }
 0x225   : > { %v828_v20 = vmul.f32 %v826_v18, %v826_v18  ;;  %1224 = vrsqrt.f32 %v641_v17  ;;  %vm645_vm10 = vcmp.eq.f32.partialorder %v641_v17, inf  ;;  %v648_v11 = vand.u32 2147483648, %v641_v17 }
 0x226   : > { %v831_v21 = vadd.f32 1e-06, %v829_v19  ;;  %vm654_vm11 = vcmp.eq.f32.partialorder %v642_v14, 0.0  ;;  %vm647_vm12 = vcmp.eq.f32.partialorder %v641_v17, 0.0 }
 0x227   : > { %v830_v22 = vadd.f32 1e-06, %v828_v20 }
 0x228   : > { %1226 = vrsqrt.f32 %v831_v21  ;;  %vm841_vm13 = vcmp.eq.f32.partialorder %v831_v21, inf  ;;  %vm843_vm14 = vcmp.eq.f32.partialorder %v831_v21, 0.0  ;;  %v844_v35 = vand.u32 2147483648, %v831_v21 }
 0x229   : > { %1228 = vrsqrt.f32 %v830_v22  ;;  %vm834_vm15 = vcmp.eq.f32.partialorder %v830_v22, inf  ;;  %v837_v37 = vand.u32 2147483648, %v830_v22  ;;  %vm836_vm0 = vcmp.eq.f32.partialorder %v830_v22, 0.0 }
 0x22e   : > { %v1223_v9 = vpop.eup %1222 }
 0x22f   : > { %v1225_v8 = vpop.eup %1224  ;;  %v651_v23 = vmul.f32 %v1223_v9, %v642_v14 }
 0x230   : > { %v644_v24 = vmul.f32 %v1225_v8, %v641_v17 }
 0x231   : > { %v653_v26 = vsel %vm652_vm9, %v642_v14, %v651_v23 }
 0x232   : > { %v1227_v27 = vpop.eup %1226  ;;  %v646_v10 = vsel %vm645_vm10, %v641_v17, %v644_v24  ;;  %v656_v28 = vsel %vm654_vm11, %v655_v25, %v653_v26 }
 0x233   : > { %v1229_v29 = vpop.eup %1228  ;;  %v649_v30 = vsel %vm647_vm12, %v648_v11, %v646_v10  ;;  %v658_v31 = vsel %vm446_vm2, %v656_v28, 0.0  ;;  %v840_v32 = vmul.f32 %v1227_v27, %v831_v21 }
 0x234   : > { %v657_v33 = vsel %vm446_vm2, %v649_v30, 0.0  ;;  %v833_v34 = vmul.f32 %v1229_v29, %v830_v22 }
 0x235   : > { %v659_v36 = vadd.f32 %v658_v31, %v657_v33  ;;  %v842_v38 = vsel %vm841_vm13, %v831_v21, %v840_v32 }
 0x236   : > { %v835_v39 = vsel %vm834_vm15, %v830_v22, %v833_v34  ;;  %v845_v40 = vsel %vm843_vm14, %v844_v35, %v842_v38 }
 0x237   : > { %660 = vadd.xlane.f32.xlu0 %v659_v36  ;;  %v838_v41 = vsel %vm836_vm0, %v837_v37, %v835_v39  ;;  %v847_v42 = vsel %vm446_vm2, %v845_v40, 0.0 }
 0x238   : > { %v846_v43 = vsel %vm446_vm2, %v838_v41, 0.0 }
 0x239   : > { %v848_v44 = vadd.f32 %v847_v42, %v846_v43 }
 0x23b   : > { %849 = vadd.xlane.f32.xlu0 %v848_v44 }
 0x2c4   : > { %v661_v45 = vpop.xlane.xlu0 %660 }
 0x2c5   : > { %v662_v46 = vrot.slane %v661_v45, 4 }
 0x2c7   : > { %v663_v47 = vadd.f32 %v662_v46, %v661_v45 }
 0x2c8   : > { %v850_v48 = vpop.xlane.xlu0 %849 }
 0x2c9   : > { %v664_v49 = vrot.slane %v663_v47, 2  ;;  %v851_v50 = vrot.slane %v850_v48, 4 }
 0x2cb   : > { %v852_v51 = vadd.f32 %v851_v50, %v850_v48  ;;  %v665_v52 = vadd.f32 %v664_v49, %v663_v47 }
 0x2cd   : > { %v853_v53 = vrot.slane %v852_v51, 2  ;;  %v666_v54 = vrot.slane %v665_v52, 1 }
 0x2cf   : > { %v854_v55 = vadd.f32 %v853_v53, %v852_v51  ;;  %v667_v56 = vadd.f32 %v666_v54, %v665_v52 }
 0x2d1   : > { %1118 = vpush %v667_v56  ;;  %v855_v57 = vrot.slane %v854_v55, 1 }
 0x2d3   : > { %v856_v58 = vadd.f32 %v855_v57, %v854_v55 }
 0x2d5   : > { %1120 = vpush %v856_v58 }
 0x302   : > { %s1119_s21 = spop %1118 }
 0x306   : > { %s1121_s15 = spop %1120 }
 0x307   : > { %s858_s0 = sadd.f32 %s1121_s15, %s1119_s21 }
 0x309   : > { %v859_v59 = vstv %s858_s0 }
 0x30a   : > { %861 = vst [vmem:[%s1538_s10] sm:$0x1] %v859_v59 }
 0x30b PF: > { %s22_s23 = sadd.s32 1, %s1316_s23   ;;  %s1614_s18 = smov %s1300_s19 }
 0x30c   : > { %p19_p1 = scmp.ge.s32.totalorder %s22_s23, 6   ;;  %s1615_s19 = smov %s1304_s20 }
 0x30d   : > { %s1616_s20 = smov %s1422_s6  ;;  %s1617_s21 = smov %s1312_s22 }
 0x30e   : > { %s1618_s22 = smov %s1620_s25  ;;  %21 = sbr.rel (!%p19_p1) target bundleno = 8 (0x8), region = 119 }
 0x315   :  { %907 = vsyncpa [#allocation3], 1 }
 0x316   :  { %909 = vsyncpa [#allocation3 + $0x1], 1 }
 0x317   :  { %910 = vsyncpa [#allocation5], 1 }
 0x318   :  { %912 = vsyncpa [#allocation5 + $0x1], 1 }

</bundles_post_ra>
